<compile_context>
chip_gen: v6e
topology: v6e:2x2x1
jax: 0.10.0
libtpu: 0.0.40
codegen_flags: <defaults>
</compile_context>

<pallas_src>
import jax
import jax.numpy as jnp
from jax.experimental import pallas as pl
from jax.experimental.pallas import tpu as pltpu

LANE = 128      # vreg lane width; feature dims padded to multiples of this
SUBLANE = 8     # sublane count; pooled batch dim padded to multiples of this


def _round_up(n, m):
    return ((n + m - 1) // m) * m


def _pad2(a, rows, cols):
    r, c = a.shape
    return jnp.pad(a, ((0, rows - r), (0, cols - c)))


def _pick_node_tile(num_nodes):
    """Node-row/col tile of the dense adjacency: 256 on 256x256-MXU chips (v6e/v7x), else 128."""
    try:
        kind = jax.devices()[0].device_kind.lower()
    except Exception:
        kind = ""
    gen_tile = 256 if any(t in kind for t in ("v6", "v7", "7x")) else 128
    # Don't pad tiny node counts up to a 256-row tile.
    return max(LANE, min(gen_tile, _round_up(num_nodes, LANE)))


def _vmem_limit(byte_sizes):
    """Size-derived scoped-VMEM limit: 2x working set + 4 MiB, clamped to [16, 64] MiB."""
    total = sum(byte_sizes)
    return int(min(64 << 20, max(16 << 20, 2 * total + (4 << 20))))


# ------------------------------ Pallas kernels ------------------------------

def gcn_aggregate_kernel(cidx_ref, cnt_ref, a_ref, y_ref, b_ref, h_ref, acc_ref):
    """h = relu(A @ Y + b) over node tiles; Y is already weight-transformed (X @ W).

    grid = (nblk, k_max): r = output node-row tile, k = k-th *nonzero* column block of
    row r (the column index comes from the scalar-prefetched cidx table via the
    index_map, so all-zero adjacency blocks are neither DMA'd nor computed).
    Trailing padded k entries (k >= cnt[r]) re-fetch a valid block but are masked out
    of the accumulation.
    """
    r = pl.program_id(0)
    k = pl.program_id(1)

    @pl.when(k == 0)
    def _init():
        acc_ref[...] = jnp.zeros_like(acc_ref)

    @pl.when(k < cnt_ref[r])
    def _accumulate():
        acc_ref[...] += jnp.dot(a_ref[...], y_ref[...],
                                preferred_element_type=jnp.float32)

    @pl.when(k == pl.num_programs(1) - 1)
    def _finalize():
        h = jnp.maximum(acc_ref[...] + b_ref[...], 0.0)   # bias + ReLU in f32
        h_ref[...] = h.astype(h_ref.dtype)


def gcn_aggregate_pool_kernel(cidx_ref, cnt_ref, a_ref, y_ref, b_ref, p_ref,
                              out_ref, acc_ref):
    """Layer 2 fused with mean pooling: out_partial[r] = P[:, r-tile] @ relu(A @ Y + b).

    Per-row-tile partial pooled outputs (summed in the wrapper) keep the row axis
    embarrassingly parallel (megacore friendly) and h2 never touches HBM.
    """
    r = pl.program_id(0)
    k = pl.program_id(1)

    @pl.when(k == 0)
    def _init():
        acc_ref[...] = jnp.zeros_like(acc_ref)

    @pl.when(k < cnt_ref[r])
    def _accumulate():
        acc_ref[...] += jnp.dot(a_ref[...], y_ref[...],
                                preferred_element_type=jnp.float32)

    @pl.when(k == pl.num_programs(1) - 1)
    def _finalize():
        h2 = jnp.maximum(acc_ref[...] + b_ref[...], 0.0).astype(jnp.bfloat16)
        out_ref[...] = jnp.dot(p_ref[...], h2, preferred_element_type=jnp.float32)


# ------------------------------ wrapper ------------------------------

def gnn_forward(a_hat, x, w1, b1, w2, b2, pool, batch, *, tile=None):
    """relu(A@(X W1)+b1) -> relu(A@(. W2)+b2) -> global mean pool."""
    n = a_hat.shape[0]
    num_graphs = pool.shape[0]
    hidden = w1.shape[1]
    out_dim = w2.shape[1]

    if tile is None:
        tile = _pick_node_tile(n)

    n_pad = _round_up(n, tile)
    hid_p = _round_up(hidden, LANE)
    out_p = _round_up(out_dim, LANE)
    b_pad = _round_up(num_graphs, SUBLANE)
    nblk = n_pad // tile

    # ---- block-diagonal occupancy of the batched adjacency, built from `batch` only ----
    # Graph g spans node indices [g_first, g_last]; block (r, c) of A_hat can only be
    # nonzero if some graph touches both blocks.  No O(N^2) pass over A is needed, and the
    # table is a superset of the true nonzero blocks even for non-contiguous batch vectors.
    node_ids = jnp.arange(n, dtype=jnp.int32)
    g_first = jax.ops.segment_min(node_ids, batch, num_segments=num_graphs)
    g_last = jax.ops.segment_max(node_ids, batch, num_segments=num_graphs)
    rblk = jnp.arange(nblk, dtype=jnp.int32)
    hits = ((g_first[None, :] // tile) <= rblk[:, None]) & \
           (rblk[:, None] <= (g_last[None, :] // tile))                    # [nblk, G]
    blk_mask = (hits.astype(jnp.int32) @ hits.astype(jnp.int32).T) > 0     # [nblk, nblk]
    counts = blk_mask.sum(axis=1).astype(jnp.int32)        # nonzero column blocks per row
    k_max = max(int(counts.max()), 1)                       # static grid extent (eager wrapper)
    sorted_key = jnp.sort(jnp.where(blk_mask, rblk[None, :], nblk), axis=1)
    col_idx = jnp.where(sorted_key < nblk, sorted_key, 0)[:, :k_max].astype(jnp.int32)
    col_idx_flat = col_idx.reshape(-1)                      # flat 1-D SMEM table (no 2-D pad)

    # ---- lane-dense padding + bf16 MXU operands (f32 accumulation in-kernel) ----
    a_bf = _pad2(a_hat.astype(jnp.bfloat16), n_pad, n_pad)
    # Feature transform contracted at the narrower/output width *outside* the kernel:
    # O(N*d_in*d_out) in XLA vs the O(N^2 * width) aggregation inside Pallas.
    y1_bf = _pad2(jnp.dot(x, w1), n_pad, hid_p).astype(jnp.bfloat16)
    b1_p = _pad2(b1, 1, hid_p).astype(jnp.float32)
    b2_p = _pad2(b2, 1, out_p).astype(jnp.float32)
    w2_bf = _pad2(w2, hid_p, out_p).astype(jnp.bfloat16)
    pool_bf = _pad2(pool, b_pad, n_pad).astype(jnp.bfloat16)

    grid = (nblk, k_max)

    def a_map(r, k, cidx, cnt):
        return (r, cidx[r * k_max + k])

    def y_map(r, k, cidx, cnt):
        return (cidx[r * k_max + k], 0)

    # ---- layer 1: h1 = relu(A @ (X W1) + b1), stored bf16 ----
    l1_vmem = _vmem_limit([
        2 * tile * tile * 2,        # A tile, bf16, double-buffered
        2 * tile * hid_p * 2,       # (X W1) tile
        2 * SUBLANE * hid_p * 4,    # bias (sublane-padded)
        2 * tile * hid_p * 2,       # h1 out tile
        tile * hid_p * 4,           # f32 accumulator scratch
    ])
    h1 = pl.pallas_call(
        gcn_aggregate_kernel,
        out_shape=jax.ShapeDtypeStruct((n_pad, hid_p), jnp.bfloat16),
        grid_spec=pltpu.PrefetchScalarGridSpec(
            num_scalar_prefetch=2,
            grid=grid,
            in_specs=[
                pl.BlockSpec((tile, tile), a_map),                          # A_hat tile
                pl.BlockSpec((tile, hid_p), y_map),                         # (X W1) tile
                pl.BlockSpec((1, hid_p), lambda r, k, cidx, cnt: (0, 0)),   # b1 (resident)
            ],
            out_specs=pl.BlockSpec((tile, hid_p), lambda r, k, cidx, cnt: (r, 0)),
            scratch_shapes=[pltpu.VMEM((tile, hid_p), jnp.float32)],
        ),
        compiler_params=pltpu.CompilerParams(
            dimension_semantics=("parallel", "arbitrary"),
            vmem_limit_bytes=l1_vmem,
        ),
    )(col_idx_flat, counts, a_bf, y1_bf, b1_p)

    # ---- layer 2 + fused global mean pooling (per-row-tile partial outputs) ----
    y2_bf = jnp.dot(h1, w2_bf, preferred_element_type=jnp.float32).astype(jnp.bfloat16)

    l2_vmem = _vmem_limit([
        2 * tile * tile * 2,        # A tile
        2 * tile * out_p * 2,       # (h1 W2) tile
        2 * SUBLANE * out_p * 4,    # bias
        2 * b_pad * tile * 2,       # pool block
        2 * b_pad * out_p * 4,      # partial pooled out tile
        tile * out_p * 4,           # f32 accumulator scratch
    ])
    partials = pl.pallas_call(
        gcn_aggregate_pool_kernel,
        out_shape=jax.ShapeDtypeStruct((nblk, b_pad, out_p), jnp.float32),
        grid_spec=pltpu.PrefetchScalarGridSpec(
            num_scalar_prefetch=2,
            grid=grid,
            in_specs=[
                pl.BlockSpec((tile, tile), a_map),                            # A_hat tile
                pl.BlockSpec((tile, out_p), y_map),                           # (h1 W2) tile
                pl.BlockSpec((1, out_p), lambda r, k, cidx, cnt: (0, 0)),     # b2 (resident)
                pl.BlockSpec((b_pad, tile), lambda r, k, cidx, cnt: (0, r)),  # pool block
            ],
            out_specs=pl.BlockSpec((None, b_pad, out_p),
                                   lambda r, k, cidx, cnt: (r, 0, 0)),
            scratch_shapes=[pltpu.VMEM((tile, out_p), jnp.float32)],
        ),
        compiler_params=pltpu.CompilerParams(
            dimension_semantics=("parallel", "arbitrary"),
            vmem_limit_bytes=l2_vmem,
        ),
    )(col_idx_flat, counts, a_bf, y2_bf, b2_p, pool_bf)

    pooled = partials.sum(axis=0)           # reduce per-row-tile partial pooled sums
    return pooled[:num_graphs, :out_dim]


# --------------------------- plain-JAX graph glue ---------------------------
# edge_index -> dense normalized adjacency and batch -> pooling matrix are
# data-dependent scatters; kept as preprocessing outside the kernels.

def normalized_adjacency(edge_index, num_nodes):
    """Dense D^-1/2 (A + I) D^-1/2, matching GCNConv's default normalization."""
    src, dst = edge_index
    a = jnp.zeros((num_nodes, num_nodes), jnp.float32)
    a = a.at[dst, src].set(1.0)                       # message flows src -> dst
    a = a + jnp.eye(num_nodes, dtype=jnp.float32)     # add self loops
    deg = a.sum(axis=1)
    d_inv_sqrt = jnp.where(deg > 0, 1.0 / jnp.sqrt(deg), 0.0)
    return d_inv_sqrt[:, None] * a * d_inv_sqrt[None, :]


def mean_pool_matrix(batch, num_graphs):
    """[B, N] matrix P with P[b, n] = 1/count_b if batch[n] == b else 0."""
    onehot = (batch[None, :] == jnp.arange(num_graphs)[:, None]).astype(jnp.float32)
    counts = onehot.sum(axis=1, keepdims=True)
    return onehot / jnp.maximum(counts, 1.0)


def glorot(key, fan_in, fan_out):
    limit = jnp.sqrt(6.0 / (fan_in + fan_out))
    return jax.random.uniform(key, (fan_in, fan_out), jnp.float32, -limit, limit)


if __name__ == "__main__":
    # Small shapes consistent with the module's forward.
    num_nodes = 16          # total nodes across the batch of graphs
    input_dim = 8
    hidden_dim_gnn = 32
    output_dim = 16
    num_graphs = 2          # two graphs of 8 nodes each

    key = jax.random.PRNGKey(0)
    kx, kw1, kw2 = jax.random.split(key, 3)

    # Node features.
    x = jax.random.normal(kx, (num_nodes, input_dim), jnp.float32)

    # Deterministic symmetric ring edges inside each graph of 8 nodes.
    per_graph = num_nodes // num_graphs
    src_list, dst_list = [], []
    for g in range(num_graphs):
        base = g * per_graph
        for i in range(per_graph):
            a_node = base + i
            b_node = base + (i + 1) % per_graph
            src_list += [a_node, b_node]
            dst_list += [b_node, a_node]
    edge_index = jnp.array([src_list, dst_list], dtype=jnp.int32)

    # Batch assignment vector (node -> graph id).
    batch = jnp.repeat(jnp.arange(num_graphs, dtype=jnp.int32), per_graph)

    # Deterministic parameter init (GCNConv: glorot weight, zero bias).
    w1 = glorot(kw1, input_dim, hidden_dim_gnn)
    b1 = jnp.zeros((1, hidden_dim_gnn), jnp.float32)
    w2 = glorot(kw2, hidden_dim_gnn, output_dim)
    b2 = jnp.zeros((1, output_dim), jnp.float32)

    a_hat = normalized_adjacency(edge_index, num_nodes)
    pool = mean_pool_matrix(batch, num_graphs)

    out = gnn_forward(a_hat, x, w1, b1, w2, b2, pool, batch)
    out = jax.block_until_ready(out)

    # Pure-JAX f32 reference; tolerance is loose because the kernels feed the MXU bf16
    # operands (f32 accumulation) and h1 is stored bf16 between the layers.
    h1_ref = jnp.maximum(a_hat @ (x @ w1) + b1, 0.0)
    h2_ref = jnp.maximum(a_hat @ (h1_ref @ w2) + b2, 0.0)
    ref = pool @ h2_ref

    assert out.shape == (num_graphs, output_dim)
    assert jnp.allclose(out, ref, rtol=5e-2, atol=5e-2), float(jnp.max(jnp.abs(out - ref)))
    print("KERNEL_OK")
</pallas_src>

<mosaic_0001>
module attributes {stable_mosaic.version = 11 : i64} {
  func.func @gcn_aggregate_kernel(%arg0: i32, %arg1: i32, %arg2: memref<1xi32, #tpu.memory_space<smem>>, %arg3: memref<1xi32, #tpu.memory_space<smem>>, %arg4: memref<128x128xbf16, #tpu.memory_space<vmem>>, %arg5: memref<128x128xbf16, #tpu.memory_space<vmem>>, %arg6: memref<1x128xf32, #tpu.memory_space<vmem>>, %arg7: memref<128x128xbf16, #tpu.memory_space<vmem>>, %arg8: memref<128x128xf32, #tpu.memory_space<vmem>>) attributes {dimension_semantics = [#tpu.dimension_semantics<parallel>, #tpu.dimension_semantics<arbitrary>], iteration_bounds = array<i64: 1, 1>, scalar_prefetch = 2 : i64, scratch_operands = 1 : i64, tpu.core_type = #tpu.core_type<tc>, window_params = [{transform_indices = @transform_0, window_bounds = array<i64: 128, 128>}, {transform_indices = @transform_1, window_bounds = array<i64: 128, 128>}, {pipeline_mode = #tpu.pipeline_mode<synchronous>, transform_indices = @transform_2, window_bounds = array<i64: 1, 128>}, {transform_indices = @transform_3, window_bounds = array<i64: 128, 128>}]} {
    %c0_i32 = arith.constant 0 : i32
    %0 = arith.cmpi eq, %arg1, %c0_i32 : i32
    %1 = arith.extui %0 : i1 to i32
    %c0_i32_0 = arith.constant 0 : i32
    %2 = arith.cmpi ne, %1, %c0_i32_0 : i32
    scf.if %2 {
      %cst = arith.constant 0.000000e+00 : f32
      %11 = vector.broadcast %cst : f32 to vector<128x128xf32>
      %c0 = arith.constant 0 : index
      %c0_4 = arith.constant 0 : index
      %12 = vector.load %arg8[%c0, %c0_4] : memref<128x128xf32, #tpu.memory_space<vmem>>, vector<128x128xf32>
      tpu.vector_store %arg8[%c0, %c0_4], %11 {strides = array<i32>} : memref<128x128xf32, #tpu.memory_space<vmem>>, vector<128x128xf32>,
    } else {
    }
    %3 = arith.index_cast %arg0 : i32 to index
    %4 = memref.load %arg3[%3] : memref<1xi32, #tpu.memory_space<smem>>
    %5 = arith.cmpi slt, %arg1, %4 : i32
    %6 = arith.extui %5 : i1 to i32
    %c0_i32_1 = arith.constant 0 : i32
    %7 = arith.cmpi ne, %6, %c0_i32_1 : i32
    scf.if %7 {
      %c0 = arith.constant 0 : index
      %c0_4 = arith.constant 0 : index
      %11 = vector.load %arg8[%c0, %c0_4] : memref<128x128xf32, #tpu.memory_space<vmem>>, vector<128x128xf32>
      %c0_5 = arith.constant 0 : index
      %c0_6 = arith.constant 0 : index
      %12 = vector.load %arg4[%c0_5, %c0_6] : memref<128x128xbf16, #tpu.memory_space<vmem>>, vector<128x128xbf16>
      %c0_7 = arith.constant 0 : index
      %c0_8 = arith.constant 0 : index
      %13 = vector.load %arg5[%c0_7, %c0_8] : memref<128x128xbf16, #tpu.memory_space<vmem>>, vector<128x128xbf16>
      %cst = arith.constant dense<0.000000e+00> : vector<128x128xf32>
      %14 = tpu.matmul %12, %13, %cst {dimension_numbers = #tpu.dot_dimension_numbers<[1], [0], [0], [1], [0, 0, 1, 1], [], []>} : vector<128x128xbf16>, vector<128x128xbf16>, vector<128x128xf32> -> vector<128x128xf32>
      %15 = arith.addf %11, %14 : vector<128x128xf32>
      %c0_9 = arith.constant 0 : index
      %c0_10 = arith.constant 0 : index
      %16 = vector.load %arg8[%c0_9, %c0_10] : memref<128x128xf32, #tpu.memory_space<vmem>>, vector<128x128xf32>
      tpu.vector_store %arg8[%c0_9, %c0_10], %15 {strides = array<i32>} : memref<128x128xf32, #tpu.memory_space<vmem>>, vector<128x128xf32>,
    } else {
    }
    %c0_i32_2 = arith.constant 0 : i32
    %8 = arith.cmpi eq, %arg1, %c0_i32_2 : i32
    %9 = arith.extui %8 : i1 to i32
    %c0_i32_3 = arith.constant 0 : i32
    %10 = arith.cmpi ne, %9, %c0_i32_3 : i32
    scf.if %10 {
      %c0 = arith.constant 0 : index
      %c0_4 = arith.constant 0 : index
      %11 = vector.load %arg8[%c0, %c0_4] : memref<128x128xf32, #tpu.memory_space<vmem>>, vector<128x128xf32>
      %c0_5 = arith.constant 0 : index
      %c0_6 = arith.constant 0 : index
      %12 = vector.load %arg6[%c0_5, %c0_6] : memref<1x128xf32, #tpu.memory_space<vmem>>, vector<1x128xf32>
      %13 = vector.broadcast %12 : vector<1x128xf32> to vector<128x128xf32>
      %14 = arith.addf %11, %13 : vector<128x128xf32>
      %cst = arith.constant 0.000000e+00 : f32
      %15 = vector.broadcast %cst : f32 to vector<128x128xf32>
      %16 = arith.maximumf %14, %15 : vector<128x128xf32>
      %17 = arith.truncf %16 : vector<128x128xf32> to vector<128x128xbf16>
      %c0_7 = arith.constant 0 : index
      %c0_8 = arith.constant 0 : index
      %18 = vector.load %arg7[%c0_7, %c0_8] : memref<128x128xbf16, #tpu.memory_space<vmem>>, vector<128x128xbf16>
      tpu.vector_store %arg7[%c0_7, %c0_8], %17 {strides = array<i32>} : memref<128x128xbf16, #tpu.memory_space<vmem>>, vector<128x128xbf16>,
    } else {
    }
    return
  }
  func.func @transform_0(%arg0: i32, %arg1: i32, %arg2: memref<1xi32, #tpu.memory_space<smem>>, %arg3: memref<1xi32, #tpu.memory_space<smem>>) -> (i32, i32) {
    %c1_i32 = arith.constant 1 : i32
    %0 = arith.muli %arg0, %c1_i32 : i32
    %1 = arith.addi %0, %arg1 : i32
    %2 = arith.index_cast %1 : i32 to index
    %3 = memref.load %arg2[%2] : memref<1xi32, #tpu.memory_space<smem>>
    %c0_i32 = arith.constant 0 : i32
    return %arg0, %3 : i32, i32
  }
  func.func @transform_1(%arg0: i32, %arg1: i32, %arg2: memref<1xi32, #tpu.memory_space<smem>>, %arg3: memref<1xi32, #tpu.memory_space<smem>>) -> (i32, i32) {
    %c1_i32 = arith.constant 1 : i32
    %0 = arith.muli %arg0, %c1_i32 : i32
    %1 = arith.addi %0, %arg1 : i32
    %2 = arith.index_cast %1 : i32 to index
    %3 = memref.load %arg2[%2] : memref<1xi32, #tpu.memory_space<smem>>
    %c0_i32 = arith.constant 0 : i32
    %c0_i32_0 = arith.constant 0 : i32
    return %3, %c0_i32 : i32, i32
  }
  func.func @transform_2(%arg0: i32, %arg1: i32, %arg2: memref<1xi32, #tpu.memory_space<smem>>, %arg3: memref<1xi32, #tpu.memory_space<smem>>) -> (i32, i32) {
    %c0_i32 = arith.constant 0 : i32
    %c0_i32_0 = arith.constant 0 : i32
    %c0_i32_1 = arith.constant 0 : i32
    return %c0_i32, %c0_i32_0 : i32, i32
  }
  func.func @transform_3(%arg0: i32, %arg1: i32, %arg2: memref<1xi32, #tpu.memory_space<smem>>, %arg3: memref<1xi32, #tpu.memory_space<smem>>) -> (i32, i32) {
    %c0_i32 = arith.constant 0 : i32
    %c0_i32_0 = arith.constant 0 : i32
    return %arg0, %c0_i32 : i32, i32
  }
}

</mosaic_0001>

<bundles_post_ra>
// kernel: tpu_custom_call.1
= control target key start
LH: loop header
LB: loop body
LE: loop exit
PB: predicated region body
PF: predicated region fallthrough
CT: control target
= control target key end

     0   :  { %12 = vsyncpa [#allocation7], 0  ;;  %s856_s0 = inlined_call_operand.<no memory space> [shape: s32[1], index: 0, kind: input, shape index: {}]   ;;  %s857_s1 = inlined_call_operand.<no memory space> [shape: s32[1], index: 1, kind: input, shape index: {}]   ;;  %s858_s2 = inlined_call_operand.hbm [shape: bf16[128,128], index: 2, kind: input, shape index: {}]   ;;  %s859_s3 = inlined_call_operand.hbm [shape: bf16[128,128], index: 3, kind: input, shape index: {}]   ;;  %s860_s4 = inlined_call_operand.vmem [shape: f32[1,128], index: 4, kind: input, shape index: {}]   ;;  %s861_s5 = inlined_call_operand.hbm [shape: bf16[128,128], index: 5, kind: output, shape index: {}]  }
   0x1   :  { %13 = vsyncpa [#allocation10], 0 }
   0x2   :  { %14 = vsyncpa [#allocation8], 0  ;;  %s520_s20 = sshll.u32 %s856_s0, 6  ;;  %s778_s24 = smov [#allocation6]  }
   0x3   :  { %s23_s23 = scalar_lea.hbm %s858_s2, %s520_s20  ;;  %s24_s25 = sshll.u32 %s778_s24, 4  ;;  %s25_s25 = int_to_ptr.vmem [resolvable:$true] %s24_s25 }
   0x4   :  { %s558_s28 = sshll.u32 %s856_s0, 10  ;;  %s708_s29 = scalar_lea.hbm %s23_s23, 1024 }
   0x5   :  { %p709_p0 = scmp.ne.s32.totalorder %s23_s23, %s708_s29  ;;  %s710_s7 = scalar_lea.hbm %s858_s2, 1024 }
   0x6   :  { %p711_p1 = scmp.lt.s32.totalorder %s23_s23, %s858_s2  ;;  %p712_p2 = scmp.lt.s32.totalorder %s710_s7, %s708_s29 }
   0x8   :  { %p713_p3 = por %p712_p2, %p711_p1 }
   0xa   :  { %p714_p4 = pnand %p713_p3, %p709_p0 }
   0xc   :  { %717 = shalt.err (!%p714_p4)
}
   0xd   :  { %s718_s10 = scalar_lea.vmem %s25_s25, 1024  ;;  %p723_p6 = scmp.lt.s32.totalorder %s25_s25, %s25_s25 }
   0xe   :  { %p719_p5 = scmp.ne.s32.totalorder %s25_s25, %s718_s10  ;;  %p724_p7 = scmp.lt.s32.totalorder %s718_s10, %s718_s10 }
  0x10   :  { %p725_p8 = por %p724_p7, %p723_p6 }
  0x12   :  { %p726_p9 = pnand %p725_p8, %p719_p5 }
  0x14   :  { %729 = shalt.err (!%p726_p9)
}
  0x15   :  { %s779_s0 = smov 64   ;;  %s780_s11 = smov 4  }
  0x16   :  { %30 = dma.hbm_to_vmem [thread:$0]  %s23_s23, 1024, %s25_s25, [#allocation7], %s779_s0, %s779_s0, %s780_s11  }
  0x17   :  { %s40_s2 = scalar_lea.hbm %s859_s3, %s558_s28  ;;  %s781_s14 = smov [#allocation9]  }
  0x18   :  { %s41_s15 = sshll.u32 %s781_s14, 4  ;;  %s730_s16 = scalar_lea.hbm %s40_s2, 1024  ;;  %s42_s15 = int_to_ptr.vmem [resolvable:$true] %s41_s15 }
  0x19   :  { %p731_p10 = scmp.ne.s32.totalorder %s40_s2, %s730_s16  ;;  %s732_s19 = scalar_lea.hbm %s859_s3, 1024 }
  0x1a   :  { %p733_p11 = scmp.lt.s32.totalorder %s40_s2, %s859_s3  ;;  %p734_p12 = scmp.lt.s32.totalorder %s732_s19, %s730_s16 }
  0x1c   :  { %p735_p13 = por %p734_p12, %p733_p11 }
  0x1e   :  { %p736_p0 = pnand %p735_p13, %p731_p10 }
  0x20   :  { %739 = shalt.err (!%p736_p0)
}
  0x21   :  { %s740_s22 = scalar_lea.vmem %s42_s15, 1024  ;;  %p745_p2 = scmp.lt.s32.totalorder %s42_s15, %s42_s15 }
  0x22   :  { %p741_p1 = scmp.ne.s32.totalorder %s42_s15, %s740_s22  ;;  %p746_p3 = scmp.lt.s32.totalorder %s740_s22, %s740_s22 }
  0x24   :  { %p747_p4 = por %p746_p3, %p745_p2 }
  0x26   :  { %p748_p5 = pnand %p747_p4, %p741_p1 }
  0x28   :  { %751 = shalt.err (!%p748_p5)
}
  0x29   :  { %47 = dma.hbm_to_vmem [thread:$0]  %s40_s2, 1024, %s42_s15, [#allocation10], %s779_s0, %s779_s0, %s780_s11  }
  0x2a   :  { %772 = dma.done.wait [#allocation7], 1024  }
  0x2b   :  { %773 = vsyncadd [#allocation7], 4294966272 }
  0x2c   :  { %774 = dma.done.wait [#allocation10], 1024  }
  0x2d   :  { %775 = vsyncadd [#allocation10], 4294966272  ;;  %v782_v0 = vmov 0.0   ;;  %p524_p6 = scmp.le.s32.totalorder %s857_s1, 0 }
  0x2e   :  { %66 = vst [vmem:[#allocation2 + $0x30] sm:$0xff] %v782_v0  ;;  %67 = vst [vmem:[#allocation2] sm:$0xff] %v782_v0 }
  0x2f   :  { %68 = vst [vmem:[#allocation2 + $0x58] sm:$0xff] %v782_v0  ;;  %69 = vst [vmem:[#allocation2 + $0x18] sm:$0xff] %v782_v0 }
  0x30   :  { %70 = vst [vmem:[#allocation2 + $0x50] sm:$0xff] %v782_v0  ;;  %71 = vst [vmem:[#allocation2 + $0x68] sm:$0xff] %v782_v0 }
  0x31   :  { %72 = vst [vmem:[#allocation2 + $0x8] sm:$0xff] %v782_v0  ;;  %73 = vst [vmem:[#allocation2 + $0x48] sm:$0xff] %v782_v0  ;;  %86 = sbr.rel (%p524_p6) target bundleno = 297 (0x129), region = 29 }
  0x32   :  { %74 = vst [vmem:[#allocation2 + $0x40] sm:$0xff] %v782_v0  ;;  %75 = vst [vmem:[#allocation2 + $0x20] sm:$0xff] %v782_v0 }
  0x33   :  { %76 = vst [vmem:[#allocation2 + $0x10] sm:$0xff] %v782_v0  ;;  %77 = vst [vmem:[#allocation2 + $0x38] sm:$0xff] %v782_v0 }
  0x34   :  { %78 = vst [vmem:[#allocation2 + $0x60] sm:$0xff] %v782_v0  ;;  %79 = vst [vmem:[#allocation2 + $0x70] sm:$0xff] %v782_v0 }
  0x35   :  { %80 = vst [vmem:[#allocation2 + $0x78] sm:$0xff] %v782_v0  ;;  %81 = vst [vmem:[#allocation2 + $0x28] sm:$0xff] %v782_v0 }
  0x36   :  { %v692_v1 = vld [vmem:[#allocation9 + $0x38] sm:$0xff]   ;;  %v693_v2 = vld [vmem:[#allocation9 + $0x30] sm:$0xff]   ;;  %v694_v3 = vld [vmem:[#allocation9 + $0x28] sm:$0xff]  }
  0x37   :  { %638 = vmatprep.subr.bf16.mxu0 %v692_v1  ;;  %670 = vmatprep.subr.bf16.mxu1 %v692_v1  ;;  %v695_v4 = vld [vmem:[#allocation9 + $0x20] sm:$0xff]   ;;  %v696_v7 = vld [vmem:[#allocation9 + $0x18] sm:$0xff]   ;;  %v697_v8 = vld [vmem:[#allocation9 + $0x10] sm:$0xff]  }
  0x38   :  { %639 = vmatpush3.bf16.msra.mxu0 %v692_v1  ;;  %678 = vmatpush3.bf16.msra.mxu1 %v692_v1  ;;  %v700_v5 = vld [vmem:[#allocation6] sm:$0xff]   ;;  %v698_v9 = vld [vmem:[#allocation9 + $0x8] sm:$0xff]   ;;  %v704_v13 = vld [vmem:[#allocation6 + $0x10] sm:$0xff]  }
  0x39   :  { %640 = vmatprep.subr.bf16.mxu0 %v693_v2  ;;  %671 = vmatprep.subr.bf16.mxu1 %v693_v2  ;;  %v701_v6 = vld [vmem:[#allocation6 + $0x20] sm:$0xff]   ;;  %v702_v11 = vld [vmem:[#allocation6 + $0x8] sm:$0xff]   ;;  %v705_v14 = vld [vmem:[#allocation6 + $0x30] sm:$0xff]  }
  0x3a   :  { %654 = vmatprep.mubr.bf16.mxu0 %v700_v5  ;;  %662 = vmatprep.mubr.bf16.mxu1 %v701_v6  ;;  %v699_v10 = vld [vmem:[#allocation9] sm:$0xff]   ;;  %v703_v12 = vld [vmem:[#allocation6 + $0x28] sm:$0xff]   ;;  %v706_v15 = vld [vmem:[#allocation6 + $0x18] sm:$0xff]  }
  0x3b   :  { %v707_v16 = vld [vmem:[#allocation6 + $0x38] sm:$0xff]   ;;  %v97_v18 = vld [vmem:[#allocation2 + $0x10] sm:$0xff]  ;;  %v95_v22 = vld [vmem:[#allocation2 + $0x40] sm:$0xff] }
  0x3c   :  { %641 = vmatpush3.bf16.msra.mxu0 %v693_v2  ;;  %679 = vmatpush3.bf16.msra.mxu1 %v693_v2  ;;  %v89_v17 = vld [vmem:[#allocation2 + $0x58] sm:$0xff]  ;;  %v87_v21 = vld [vmem:[#allocation2 + $0x30] sm:$0xff]  ;;  %v88_v33 = vld [vmem:[#allocation2] sm:$0xff] }
  0x3d   :  { %642 = vmatprep.subr.bf16.mxu0 %v694_v3  ;;  %672 = vmatprep.subr.bf16.mxu1 %v694_v3  ;;  %v90_v27 = vld [vmem:[#allocation2 + $0x18] sm:$0xff]  ;;  %v96_v34 = vld [vmem:[#allocation2 + $0x20] sm:$0xff]  ;;  %v93_v39 = vld [vmem:[#allocation2 + $0x8] sm:$0xff] }
  0x3e   :  { %v98_v28 = vld [vmem:[#allocation2 + $0x38] sm:$0xff]  ;;  %v91_v45 = vld [vmem:[#allocation2 + $0x50] sm:$0xff]  ;;  %v99_v46 = vld [vmem:[#allocation2 + $0x60] sm:$0xff] }
  0x3f   :  { %v101_v40 = vld [vmem:[#allocation2 + $0x78] sm:$0xff]  ;;  %v94_v51 = vld [vmem:[#allocation2 + $0x48] sm:$0xff]  ;;  %v100_v58 = vld [vmem:[#allocation2 + $0x70] sm:$0xff] }
  0x40   :  { %643 = vmatpush3.bf16.msra.mxu0 %v694_v3  ;;  %680 = vmatpush3.bf16.msra.mxu1 %v694_v3  ;;  %v102_v52 = vld [vmem:[#allocation2 + $0x28] sm:$0xff] }
  0x41   :  { %644 = vmatprep.subr.bf16.mxu0 %v695_v4  ;;  %673 = vmatprep.subr.bf16.mxu1 %v695_v4  ;;  %v92_v57 = vld [vmem:[#allocation2 + $0x68] sm:$0xff] }
  0x44   :  { %645 = vmatpush3.bf16.msra.mxu0 %v695_v4  ;;  %681 = vmatpush3.bf16.msra.mxu1 %v695_v4 }
  0x45   :  { %646 = vmatprep.subr.bf16.mxu0 %v696_v7  ;;  %674 = vmatprep.subr.bf16.mxu1 %v696_v7 }
  0x48   :  { %647 = vmatpush3.bf16.msra.mxu0 %v696_v7  ;;  %682 = vmatpush3.bf16.msra.mxu1 %v696_v7 }
  0x49   :  { %648 = vmatprep.subr.bf16.mxu0 %v697_v8  ;;  %675 = vmatprep.subr.bf16.mxu1 %v697_v8 }
  0x4c   :  { %649 = vmatpush3.bf16.msra.mxu0 %v697_v8  ;;  %683 = vmatpush3.bf16.msra.mxu1 %v697_v8 }
  0x4d   :  { %650 = vmatprep.subr.bf16.mxu0 %v698_v9  ;;  %676 = vmatprep.subr.bf16.mxu1 %v698_v9 }
  0x50   :  { %651 = vmatpush3.bf16.msra.mxu0 %v698_v9  ;;  %684 = vmatpush3.bf16.msra.mxu1 %v698_v9 }
  0x51   :  { %652 = vmatprep.subr.bf16.mxu0 %v699_v10  ;;  %677 = vmatprep.subr.bf16.mxu1 %v699_v10 }
  0x54   :  { %653 = vmatpush3.bf16.msra.mxu0 %v699_v10  ;;  %685 = vmatpush3.bf16.msra.mxu1 %v699_v10 }
  0x57   :  { %655 = vmatmul.mubr.bf16.vlgmr.msra.gmra.mxu0 %v702_v11  ;;  %663 = vmatmul.mubr.bf16.vlgmr.msra.gmra.mxu1 %v703_v12 }
  0x58   :  { %658 = vmatprep.mubr.bf16.mxu0 %v704_v13  ;;  %666 = vmatprep.mubr.bf16.mxu1 %v705_v14 }
  0x5f   :  { %659 = vmatmul.mubr.bf16.gmra.mxu0 %v706_v15  ;;  %667 = vmatmul.mubr.bf16.gmra.mxu1 %v707_v16 }
 0x117   :  { %v656_v19 = vpop.f32.mrf.mxu0  ;;  %v664_v20 = vpop.f32.mrf.mxu1 }
 0x118   :  { %v330_v23 = vadd.f32 %v656_v19, %v89_v17  ;;  %v338_v24 = vadd.f32 %v664_v20, %v97_v18 }
 0x119   :  { %v265_v25 = vpop.f32.mrf.mxu0  ;;  %v297_v26 = vpop.f32.mrf.mxu1 }
 0x11a   :  { %346 = vst [vmem:[#allocation2 + $0x58] sm:$0xff] %v330_v23  ;;  %354 = vst [vmem:[#allocation2 + $0x10] sm:$0xff] %v338_v24  ;;  %v328_v29 = vadd.f32 %v265_v25, %v87_v21  ;;  %v336_v30 = vadd.f32 %v297_v26, %v95_v22 }
 0x11b   :  { %v657_v31 = vpop.f32.mrf.mxu0  ;;  %v665_v32 = vpop.f32.mrf.mxu1 }
 0x11c   :  { %344 = vst [vmem:[#allocation2 + $0x30] sm:$0xff] %v328_v29  ;;  %352 = vst [vmem:[#allocation2 + $0x40] sm:$0xff] %v336_v30  ;;  %v331_v35 = vadd.f32 %v657_v31, %v90_v27  ;;  %v339_v36 = vadd.f32 %v665_v32, %v98_v28 }
 0x11d   :  { %v268_v37 = vpop.f32.mrf.mxu0  ;;  %v300_v38 = vpop.f32.mrf.mxu1 }
 0x11e   :  { %347 = vst [vmem:[#allocation2 + $0x18] sm:$0xff] %v331_v35  ;;  %355 = vst [vmem:[#allocation2 + $0x38] sm:$0xff] %v339_v36  ;;  %v329_v41 = vadd.f32 %v268_v37, %v88_v33  ;;  %v337_v42 = vadd.f32 %v300_v38, %v96_v34 }
 0x11f   :  { %v660_v43 = vpop.f32.mrf.mxu0  ;;  %v668_v44 = vpop.f32.mrf.mxu1 }
 0x120   :  { %345 = vst [vmem:[#allocation2] sm:$0xff] %v329_v41  ;;  %353 = vst [vmem:[#allocation2 + $0x20] sm:$0xff] %v337_v42  ;;  %v334_v47 = vadd.f32 %v660_v43, %v93_v39  ;;  %v342_v48 = vadd.f32 %v668_v44, %v101_v40 }
 0x121   :  { %v281_v49 = vpop.f32.mrf.mxu0  ;;  %v313_v50 = vpop.f32.mrf.mxu1 }
 0x122   :  { %350 = vst [vmem:[#allocation2 + $0x8] sm:$0xff] %v334_v47  ;;  %358 = vst [vmem:[#allocation2 + $0x78] sm:$0xff] %v342_v48  ;;  %v332_v53 = vadd.f32 %v281_v49, %v91_v45  ;;  %v340_v54 = vadd.f32 %v313_v50, %v99_v46 }
 0x123   :  { %v661_v55 = vpop.f32.mrf.mxu0  ;;  %v669_v56 = vpop.f32.mrf.mxu1 }
 0x124   :  { %348 = vst [vmem:[#allocation2 + $0x50] sm:$0xff] %v332_v53  ;;  %356 = vst [vmem:[#allocation2 + $0x60] sm:$0xff] %v340_v54  ;;  %v335_v59 = vadd.f32 %v661_v55, %v94_v51  ;;  %v343_v60 = vadd.f32 %v669_v56, %v102_v52 }
 0x125   :  { %v284_v61 = vpop.f32.mrf.mxu0  ;;  %v316_v62 = vpop.f32.mrf.mxu1 }
 0x126   :  { %351 = vst [vmem:[#allocation2 + $0x48] sm:$0xff] %v335_v59  ;;  %359 = vst [vmem:[#allocation2 + $0x28] sm:$0xff] %v343_v60  ;;  %v333_v63 = vadd.f32 %v284_v61, %v92_v57  ;;  %v341_v0 = vadd.f32 %v316_v62, %v100_v58 }
 0x128   :  { %349 = vst [vmem:[#allocation2 + $0x68] sm:$0xff] %v333_v63  ;;  %357 = vst [vmem:[#allocation2 + $0x70] sm:$0xff] %v341_v0 }
 0x129 PF:  { %v363_v1 = vld [vmem:[#allocation2 + $0x30] sm:$0xff]  ;;  %v364_v2 = vld [vmem:[#allocation2] sm:$0xff]  ;;  %v365_v6 = vld [vmem:[#allocation2 + $0x58] sm:$0xff] }
 0x12a   :  { %v541_v3 = vld [vmem:[%s860_s4] ss:$0 sm:$0xff]  ;;  %v366_v7 = vld [vmem:[#allocation2 + $0x18] sm:$0xff]  ;;  %s783_s4 = smov [#allocation11]  }
 0x12b   :  { %v386_v4 = vadd.f32 %v541_v3, %v363_v1  ;;  %v387_v5 = vadd.f32 %v541_v3, %v364_v2  ;;  %v367_v8 = vld [vmem:[#allocation2 + $0x50] sm:$0xff]  ;;  %v388_v9 = vadd.f32 %v541_v3, %v365_v6  ;;  %v389_v10 = vadd.f32 %v541_v3, %v366_v7  ;;  %v369_v13 = vld [vmem:[#allocation2 + $0x8] sm:$0xff]  ;;  %s503_s25 = sshll.u32 %s783_s4, 4  ;;  %s504_s25 = int_to_ptr.vmem [resolvable:$true] %s503_s25 }
 0x12c   :  { %v390_v12 = vadd.f32 %v541_v3, %v367_v8  ;;  %v392_v18 = vadd.f32 %v541_v3, %v369_v13  ;;  %v371_v19 = vld [vmem:[#allocation2 + $0x40] sm:$0xff]  ;;  %s752_s26 = scalar_lea.vmem %s504_s25, 1024  ;;  %p757_p8 = scmp.lt.s32.totalorder %s504_s25, %s504_s25 }
 0x12d   :  { %v370_v14 = vld [vmem:[#allocation2 + $0x48] sm:$0xff]  ;;  %v402_v15 = vmax.f32 %v386_v4, 0.0  ;;  %v403_v16 = vmax.f32 %v387_v5, 0.0  ;;  %v372_v20 = vld [vmem:[#allocation2 + $0x20] sm:$0xff]  ;;  %v373_v21 = vld [vmem:[#allocation2 + $0x10] sm:$0xff]  ;;  %v404_v22 = vmax.f32 %v388_v9, 0.0  ;;  %v394_v31 = vadd.f32 %v541_v3, %v371_v19  ;;  %p753_p7 = scmp.ne.s32.totalorder %s504_s25, %s752_s26  ;;  %p758_p9 = scmp.lt.s32.totalorder %s752_s26, %s752_s26 }
 0x12e   :  { %v405_v23 = vmax.f32 %v389_v10, 0.0  ;;  %v406_v24 = vmax.f32 %v390_v12, 0.0  ;;  %v393_v25 = vadd.f32 %v541_v3, %v370_v14  ;;  %v374_v26 = vld [vmem:[#allocation2 + $0x38] sm:$0xff]  ;;  %v375_v27 = vld [vmem:[#allocation2 + $0x60] sm:$0xff]  ;;  %v408_v30 = vmax.f32 %v392_v18, 0.0 }
 0x12f   :  { %v368_v11 = vld [vmem:[#allocation2 + $0x68] sm:$0xff]  ;;  %v578_v28 = vpack.c.bf16 %v403_v16, %v402_v15  ;;  %v376_v32 = vld [vmem:[#allocation2 + $0x70] sm:$0xff]  ;;  %v395_v35 = vadd.f32 %v541_v3, %v372_v20  ;;  %v396_v36 = vadd.f32 %v541_v3, %v373_v21  ;;  %v377_v37 = vld [vmem:[#allocation2 + $0x78] sm:$0xff]  ;;  %v410_v40 = vmax.f32 %v394_v31, 0.0  ;;  %p759_p10 = por %p758_p9, %p757_p8 }
 0x130   :  { %v391_v17 = vadd.f32 %v541_v3, %v368_v11  ;;  %v583_v33 = vpack.c.bf16 %v405_v23, %v404_v22  ;;  %v409_v34 = vmax.f32 %v393_v25, 0.0  ;;  %v378_v38 = vld [vmem:[#allocation2 + $0x28] sm:$0xff]  ;;  %v397_v41 = vadd.f32 %v541_v3, %v374_v26 }
 0x131   :  { %579 = vst [vmem:[#allocation11] sm:$0xff] %v578_v28   ;;  %v398_v42 = vadd.f32 %v541_v3, %v375_v27  ;;  %v411_v44 = vmax.f32 %v395_v35, 0.0  ;;  %v412_v45 = vmax.f32 %v396_v36, 0.0  ;;  %v399_v46 = vadd.f32 %v541_v3, %v376_v32  ;;  %p760_p11 = pnand %p759_p10, %p753_p7 }
 0x132   :  { %v407_v29 = vmax.f32 %v391_v17, 0.0  ;;  %615 = vst [vmem:[#allocation11 + $0x8] sm:$0xff] %v583_v33   ;;  %v593_v43 = vpack.c.bf16 %v409_v34, %v408_v30  ;;  %v413_v47 = vmax.f32 %v397_v41, 0.0  ;;  %v400_v49 = vadd.f32 %v541_v3, %v377_v37 }
 0x133   :  { %v414_v48 = vmax.f32 %v398_v42, 0.0  ;;  %v401_v50 = vadd.f32 %v541_v3, %v378_v38  ;;  %v598_v51 = vpack.c.bf16 %v411_v44, %v410_v40  ;;  %v415_v52 = vmax.f32 %v399_v46, 0.0 }
 0x134   :  { %v588_v39 = vpack.c.bf16 %v407_v29, %v406_v24  ;;  %617 = vst [vmem:[#allocation11 + $0x18] sm:$0xff] %v593_v43   ;;  %v603_v53 = vpack.c.bf16 %v413_v47, %v412_v45  ;;  %v416_v54 = vmax.f32 %v400_v49, 0.0 }
 0x135   :  { %v417_v55 = vmax.f32 %v401_v50, 0.0  ;;  %618 = vst [vmem:[#allocation11 + $0x20] sm:$0xff] %v598_v51   ;;  %v608_v56 = vpack.c.bf16 %v415_v52, %v414_v48 }
 0x136   :  { %616 = vst [vmem:[#allocation11 + $0x10] sm:$0xff] %v588_v39   ;;  %619 = vst [vmem:[#allocation11 + $0x28] sm:$0xff] %v603_v53  }
 0x137   :  { %v613_v57 = vpack.c.bf16 %v417_v55, %v416_v54  ;;  %620 = vst [vmem:[#allocation11 + $0x30] sm:$0xff] %v608_v56  }
 0x139   :  { %621 = vst [vmem:[#allocation11 + $0x38] sm:$0xff] %v613_v57  }
 0x13a   :  { %763 = shalt.err (!%p760_p11)
}
 0x13b   :  { %509 = dma.vmem_to_hbm [thread:$0]  %s504_s25, 1024, %s861_s5, [#allocation8], %s779_s0, %s779_s0, %s780_s11  }
 0x13c   :  { %776 = dma.done.wait [#allocation8], 1024  }
 0x13d   :  { %777 = vsyncadd [#allocation8], 4294966272 }
 0x13e   :  { %513 = vsyncpa [#allocation7], 1 }
 0x13f   :  { %514 = vsyncpa [#allocation10], 1 }
 0x140   :  { %515 = vsyncpa [#allocation8], 1 }

</bundles_post_ra>
